<compile_context>
chip_gen: v7x
topology: tpu7x:2x2x1
jax: 0.10.0
libtpu: 0.0.40
codegen_flags: <defaults>
</compile_context>

<pallas_src>
import jax
import jax.numpy as jnp
from jax.experimental import pallas as pl
from jax.experimental.pallas import tpu as pltpu

LANE_CANDIDATES = (512, 256, 128)  # lane-dense last-dim widths (multiples of 128)
DEFAULT_LANE_W = 512               # ragged-fallback width


def _make_lambda_kernel(f):
    def kernel(x_ref, o_ref):
        # Elementwise f on the whole VMEM tile.
        o_ref[...] = f(x_ref[...])
    return kernel


def _target_tile_bytes():
    """Per-tile byte budget, scaled by TPU generation (HBM BW vs per-step overhead)."""
    try:
        kind = jax.devices()[0].device_kind.lower()
    except Exception:
        kind = ""
    if "v7" in kind:
        # ~3.2 TB/s HBM: 4 MiB tiles keep per-grid-step overhead <~10%; in+out
        # double-buffered = 16 MiB, within v7x's 32 MiB scoped-VMEM default.
        return 4 << 20
    if "v6" in kind:
        return 2 << 20  # 8 MiB double-buffered, well under the 32 MiB default
    # v5e (16 MiB scoped default) and unknown parts: stay conservative.
    return 1 << 20


def _row_multiple(itemsize):
    # Sublane packing: f32 -> 8-row vreg tiles, bf16 -> 16, int8/fp8 -> 32.
    return max(8, 32 // max(int(itemsize), 1))


def lambda_forward(x, f=lambda v: jnp.maximum(v, 0)):
    """Lambda(f).forward(x); elementwise f lowered to a tiled Pallas TPU kernel."""
    orig_shape = x.shape
    total = x.size

    out_aval = jax.eval_shape(f, jax.ShapeDtypeStruct(x.shape, x.dtype))
    if out_aval.shape != x.shape:
        # TODO(synk): non-elementwise / shape-changing user callables f have no
        # clean standalone-kernel equivalent here; run as plain JAX instead.
        return f(x)
    out_dtype = out_aval.dtype

    if total == 0:
        return jnp.zeros(orig_shape, out_dtype)

    # Pick a lane-dense width that divides the flat size so the (rows, W)
    # reshape is a free bitcast (no jnp.pad / output-slice HBM passes).
    lane_w = next((w for w in LANE_CANDIDATES if total % w == 0), None)
    flat = x.reshape(-1)
    padded = False
    if lane_w is None:
        # TODO(synk): genuinely ragged sizes fall back to pad+slice; the
        # zero-copy alternative is an in-kernel tail mask via scalar prefetch.
        lane_w = DEFAULT_LANE_W
        pad = (-total) % lane_w
        flat = jnp.pad(flat, (0, pad))
        padded = True
    rows = flat.size // lane_w
    slab = flat.reshape(rows, lane_w)

    itemsize = int(x.dtype.itemsize)
    row_mult = _row_multiple(itemsize)
    tile_bytes = _target_tile_bytes()
    tile_r_max = max(row_mult,
                     (tile_bytes // (lane_w * itemsize)) // row_mult * row_mult)

    slab_bytes = rows * lane_w * itemsize
    if rows > tile_r_max:
        tile_r = tile_r_max
    elif slab_bytes >= (2 << 20) and rows >= 4 * row_mult:
        # Mid-sized slab: force ~4 parallel grid steps so v7x's two TensorCores
        # both stream (no effect on single-TC v5e/v6e).
        tile_r = max(row_mult, pl.cdiv(pl.cdiv(rows, 4), row_mult) * row_mult)
    else:
        # Small slab: a single full-array block (always a legal block shape);
        # per-call overhead dominates here anyway.
        tile_r = rows
    grid = (pl.cdiv(rows, tile_r),)

    out_slab = pl.pallas_call(
        _make_lambda_kernel(f),
        out_shape=jax.ShapeDtypeStruct((rows, lane_w), out_dtype),
        grid_spec=pltpu.PrefetchScalarGridSpec(
            num_scalar_prefetch=0,
            grid=grid,
            in_specs=[pl.BlockSpec((tile_r, lane_w), lambda i: (i, 0))],
            out_specs=pl.BlockSpec((tile_r, lane_w), lambda i: (i, 0)),
        ),
        compiler_params=pltpu.CompilerParams(
            dimension_semantics=("parallel",)),
    )(slab)

    out_flat = out_slab.reshape(-1)
    if padded:
        out_flat = out_flat[:total]
    return out_flat.reshape(orig_shape)


if __name__ == "__main__":
    key = jax.random.PRNGKey(0)

    # Small NCHW input consistent with a conv-net feature map (single-block path,
    # divisible by 512 -> no pad / no output slice).
    x = jax.random.normal(key, (2, 4, 16, 16), dtype=jnp.float32)
    y = jax.block_until_ready(lambda_forward(x, lambda v: jnp.maximum(v, 0)))
    assert y.shape == x.shape
    assert y.dtype == x.dtype
    assert jnp.allclose(y, jnp.maximum(x, 0.0)), \
        "Pallas Lambda(relu) mismatch vs reference (small)"

    # Larger activation slab: multi-step pipelined grid (>= 2 tiles on every part).
    x_big = jax.random.normal(jax.random.PRNGKey(1), (8, 32, 64, 64), dtype=jnp.float32)
    y_big = jax.block_until_ready(lambda_forward(x_big))
    assert jnp.allclose(y_big, jnp.maximum(x_big, 0.0)), \
        "Pallas Lambda(relu) mismatch vs reference (large)"

    # bf16 input exercises the dtype-scaled tiling (constant tile bytes,
    # 16-row sublane-packing multiple).
    x_bf16 = jax.random.normal(jax.random.PRNGKey(2), (4, 8, 32, 32)).astype(jnp.bfloat16)
    y_bf16 = jax.block_until_ready(lambda_forward(x_bf16))
    assert y_bf16.dtype == jnp.bfloat16
    assert jnp.allclose(y_bf16.astype(jnp.float32),
                        jnp.maximum(x_bf16, 0).astype(jnp.float32)), \
        "Pallas Lambda(relu) mismatch vs reference (bf16)"

    # Ragged size (not a multiple of 128) exercises the pad+slice fallback.
    x_rag = jax.random.normal(jax.random.PRNGKey(3), (2, 3, 5, 7), dtype=jnp.float32)
    y_rag = jax.block_until_ready(lambda_forward(x_rag))
    assert jnp.allclose(y_rag, jnp.maximum(x_rag, 0.0)), \
        "Pallas Lambda(relu) mismatch vs reference (ragged)"

    print("KERNEL_OK")
</pallas_src>

<mosaic_0001>
module attributes {stable_mosaic.version = 11 : i64} {
  func.func @kernel(%arg0: i32, %arg1: memref<4x512xf32, #tpu.memory_space<vmem>>, %arg2: memref<4x512xf32, #tpu.memory_space<vmem>>) attributes {dimension_semantics = [#tpu.dimension_semantics<parallel>], iteration_bounds = array<i64: 1>, scalar_prefetch = 0 : i64, scratch_operands = 0 : i64, tpu.core_type = #tpu.core_type<tc>, window_params = [{transform_indices = @transform_0, window_bounds = array<i64: 4, 512>}, {transform_indices = @transform_1, window_bounds = array<i64: 4, 512>}]} {
    %c0 = arith.constant 0 : index
    %c0_0 = arith.constant 0 : index
    %0 = vector.load %arg1[%c0, %c0_0] : memref<4x512xf32, #tpu.memory_space<vmem>>, vector<4x512xf32>
    %cst = arith.constant 0.000000e+00 : f32
    %1 = vector.broadcast %cst : f32 to vector<4x512xf32>
    %2 = arith.maximumf %0, %1 : vector<4x512xf32>
    %c0_1 = arith.constant 0 : index
    %c0_2 = arith.constant 0 : index
    %3 = vector.load %arg2[%c0_1, %c0_2] : memref<4x512xf32, #tpu.memory_space<vmem>>, vector<4x512xf32>
    tpu.vector_store %arg2[%c0_1, %c0_2], %2 {strides = array<i32>} : memref<4x512xf32, #tpu.memory_space<vmem>>, vector<4x512xf32>,
    return
  }
  func.func @transform_0(%arg0: i32) -> (i32, i32) {
    %c0_i32 = arith.constant 0 : i32
    %c0_i32_0 = arith.constant 0 : i32
    return %arg0, %c0_i32 : i32, i32
  }
  func.func @transform_1(%arg0: i32) -> (i32, i32) {
    %c0_i32 = arith.constant 0 : i32
    %c0_i32_0 = arith.constant 0 : i32
    return %arg0, %c0_i32 : i32, i32
  }
}

</mosaic_0001>

<bundles_post_ra>
// kernel: tpu_custom_call.1
= control target key start
LH: loop header
LB: loop body
LE: loop exit
PB: predicated region body
PF: predicated region fallthrough
CT: control target
= control target key end

     0   :  { %6 = vsyncpa [#allocation3], 0  ;;  %s128_s0 = inlined_call_operand.hbm [shape: f32[4,512], index: 0, kind: input, shape index: {}]   ;;  %s129_s1 = inlined_call_operand.hbm [shape: f32[4,512], index: 1, kind: output, shape index: {}]  }
   0x1   :  { %7 = vsyncpa [#allocation4], 0  ;;  %s92_s6 = smov [#allocation2]   ;;  %s44_s10 = scalar_lea.hbm %s128_s0, 256 }
   0x2   :  { %s14_s7 = sshll.u32 %s92_s6, 4  ;;  %p45_p0 = scmp.ne.s32.totalorder %s128_s0, %s44_s10  ;;  %s15_s7 = int_to_ptr.vmem [resolvable:$true] %s14_s7 }
   0x3   :  { %p48_p1 = scmp.lt.u32.totalorder %s44_s10, %s128_s0 }
   0x5   :  { %p50_p2 = pnand %p48_p1, %p45_p0 }
   0x7   :  { %53 = shalt.err (!%p50_p2)
}
   0x8   :  { %s54_s15 = scalar_lea.vmem %s15_s7, 256  ;;  %p59_p4 = scmp.lt.s32.totalorder %s15_s7, %s15_s7 }
   0x9   :  { %p55_p3 = scmp.ne.s32.totalorder %s15_s7, %s54_s15  ;;  %p60_p5 = scmp.lt.s32.totalorder %s54_s15, %s54_s15 }
   0xb   :  { %p61_p6 = por %p60_p5, %p59_p4 }
   0xd   :  { %p62_p7 = pnand %p61_p6, %p55_p3 }
   0xf   :  { %65 = shalt.err (!%p62_p7)
}
  0x10   :  { %17 = dma.hbm_to_vmem [thread:$0]  %s128_s0, 256, %s15_s7, [#allocation3]  }
  0x11   :  { %88 = dma.done.wait [#allocation3], 256  }
  0x12   :  { %89 = vsyncadd [#allocation3], 4294967040  ;;  %s93_s18 = smov [#allocation5]   ;;  %v21_v0 = vld [vmem:[#allocation2] sm:$0xff]  ;;  %v22_v1 = vld [vmem:[#allocation2 + $0x8] sm:$0xff] }
  0x13   :  { %s33_s19 = sshll.u32 %s93_s18, 4  ;;  %v23_v2 = vmax.f32 %v21_v0, 0.0  ;;  %v24_v3 = vmax.f32 %v22_v1, 0.0  ;;  %s34_s19 = int_to_ptr.vmem [resolvable:$true] %s33_s19 }
  0x14   :  { %s66_s20 = scalar_lea.vmem %s34_s19, 256  ;;  %p71_p9 = scmp.lt.s32.totalorder %s34_s19, %s34_s19 }
  0x15   :  { %25 = vst [vmem:[#allocation5] sm:$0xff] %v23_v2  ;;  %26 = vst [vmem:[#allocation5 + $0x8] sm:$0xff] %v24_v3  ;;  %p67_p8 = scmp.ne.s32.totalorder %s34_s19, %s66_s20  ;;  %p72_p10 = scmp.lt.s32.totalorder %s66_s20, %s66_s20 }
  0x17   :  { %p73_p11 = por %p72_p10, %p71_p9 }
  0x19   :  { %p74_p12 = pnand %p73_p11, %p67_p8 }
  0x1b   :  { %77 = shalt.err (!%p74_p12)
}
  0x1c   :  { %s78_s22 = scalar_lea.hbm %s129_s1, 256 }
  0x1d   :  { %p79_p13 = scmp.ne.s32.totalorder %s129_s1, %s78_s22  ;;  %p82_p0 = scmp.lt.u32.totalorder %s78_s22, %s129_s1 }
  0x1f   :  { %p84_p1 = pnand %p82_p0, %p79_p13 }
  0x21   :  { %87 = shalt.err (!%p84_p1)
}
  0x22   :  { %36 = dma.vmem_to_hbm [thread:$0]  %s34_s19, 256, %s129_s1, [#allocation4]  }
  0x23   :  { %90 = dma.done.wait [#allocation4], 256  }
  0x24   :  { %91 = vsyncadd [#allocation4], 4294967040 }
  0x25   :  { %40 = vsyncpa [#allocation3], 1 }
  0x26   :  { %41 = vsyncpa [#allocation4], 1 }

</bundles_post_ra>
